<compile_context>
chip_gen: v5e
topology: v5e:2x2
jax: 0.10.0
libtpu: 0.0.40
codegen_flags: <defaults>
</compile_context>

<pallas_src>
import functools

import jax
import jax.numpy as jnp
from jax import lax
from jax.experimental import pallas as pl
from jax.experimental.pallas import tpu as pltpu


def _stats_kernel(x5_ref, w_ref, sum_ref, ssq_ref):
    # x5_ref : (1, 5*Cin, TL)    im2col tile, pooled positions on lanes
    # w_ref  : (3*Cout, 5*Cin)   fused conv weight (3 taps x 3 pooling phases)
    # sum_ref, ssq_ref : (1, 1, 3*Cout, 1)   per-tile partial statistics
    y3 = jnp.dot(w_ref[...], x5_ref[0], preferred_element_type=jnp.float32)
    sum_ref[0, 0] = jnp.sum(y3, axis=1, keepdims=True)
    ssq_ref[0, 0] = jnp.sum(y3 * y3, axis=1, keepdims=True)


def _norm_kernel(x5_ref, w_ref, scale_ref, shift_ref, o_ref, *, Cout):
    # Recompute the conv tile, apply the precomputed BN affine, pool over the 3 phases,
    # then ELU (monotonic -> commutes with the max, so only Cout rows hit the EUP).
    y3 = jnp.dot(w_ref[...], x5_ref[0], preferred_element_type=jnp.float32)  # (3*Cout, TL)
    z3 = y3 * scale_ref[...] + shift_ref[...]
    z = jnp.maximum(jnp.maximum(z3[:Cout], z3[Cout:2 * Cout]), z3[2 * Cout:])
    o_ref[0] = jnp.where(z > 0, z, jnp.exp(jnp.minimum(z, 0.0)) - 1.0).astype(o_ref.dtype)


_TL_MAX = 8192  # lane tile of pooled positions; tiny channel counts keep VMEM << 32 MiB


@jax.jit
def conv_block_forward(x_ncl, w_oik, b_o, gamma_o, beta_o, eps=1e-5):
    """ConvBlock forward.  x_ncl: (B, Cin, L) as in PyTorch; returns (B, Cout, L // 3)."""
    del b_o  # conv bias cancels exactly under training-mode BatchNorm (it only affects
    #          the unmodeled running_mean buffer).
    B, Cin, L = x_ncl.shape
    Cout = w_oik.shape[0]
    assert L % 3 == 0, "example assumes L divisible by 3 (MaxPool1d(3,3) drops no positions)"
    Lout = L // 3

    x = x_ncl.astype(jnp.float32)
    w = w_oik.astype(jnp.float32)

    # im2col over pool windows: X5[b, s*Cin + i, l] = x_pad[b, i, 3l + s], s = 0..4,
    # where x_pad is x zero-padded by one on each side of L (the conv padding).
    x_pad = jnp.pad(x, ((0, 0), (0, 0), (1, 1)))  # (B, Cin, L+2)
    X5 = jnp.concatenate(
        [x_pad[:, :, s: s + 3 * (Lout - 1) + 1: 3] for s in range(5)], axis=1
    )  # (B, 5*Cin, Lout)

    # Fused weight: Wbig[k*Cout + o, s*Cin + i] = w[o, i, s - k] for 0 <= s - k <= 2,
    # so one matmul yields the conv output for all 3 pooling phases k.
    Wbig = jnp.zeros((3 * Cout, 5 * Cin), jnp.float32)
    for k in range(3):      # pooling phase
        for t in range(3):  # conv tap
            Wbig = Wbig.at[k * Cout:(k + 1) * Cout,
                           (k + t) * Cin:(k + t + 1) * Cin].set(w[:, :, t])

    # Lane tiling over pooled positions.
    if Lout <= _TL_MAX:
        TL, nl, Lp = Lout, 1, Lout
    else:
        TL = _TL_MAX
        nl = pl.cdiv(Lout, TL)
        Lp = nl * TL
        # Zero tail contributes exactly 0 to both sum and sum-of-squares in pass 1.
        X5 = jnp.pad(X5, ((0, 0), (0, 0), (0, Lp - Lout)))

    grid = (B, nl)
    cparams = pltpu.CompilerParams(
        dimension_semantics=("parallel", "parallel"),
        vmem_limit_bytes=32 * 1024 * 1024,
    )
    x5_spec = pl.BlockSpec((1, 5 * Cin, TL), lambda b, l: (b, 0, l))
    w_spec = pl.BlockSpec((3 * Cout, 5 * Cin), lambda b, l: (0, 0))

    # ---- Pass 1: per-tile partial sum / sum-of-squares of the conv output ------------
    stat_shape = jax.ShapeDtypeStruct((B, nl, 3 * Cout, 1), jnp.float32)
    stat_spec = pl.BlockSpec((1, 1, 3 * Cout, 1), lambda b, l: (b, l, 0, 0))
    part_sum, part_ssq = pl.pallas_call(
        _stats_kernel,
        out_shape=(stat_shape, stat_shape),
        grid_spec=pltpu.PrefetchScalarGridSpec(
            num_scalar_prefetch=0,
            grid=grid,
            in_specs=[x5_spec, w_spec],
            out_specs=(stat_spec, stat_spec),
        ),
        compiler_params=cparams,
    )(X5, Wbig)

    # Combine the tiny partials into per-channel batch statistics (plain XLA, negligible).
    n = float(B * L)
    s1 = jnp.sum(part_sum, axis=(0, 1))[:, 0].reshape(3, Cout).sum(axis=0)   # (Cout,)
    s2 = jnp.sum(part_ssq, axis=(0, 1))[:, 0].reshape(3, Cout).sum(axis=0)   # (Cout,)
    mean = s1 / n
    var = jnp.maximum(s2 / n - mean * mean, 0.0)   # biased batch variance
    inv = lax.rsqrt(var + eps)
    scale = gamma_o.astype(jnp.float32) * inv
    shift = beta_o.astype(jnp.float32) - mean * scale
    scale3 = jnp.tile(scale, 3).reshape(3 * Cout, 1)
    shift3 = jnp.tile(shift, 3).reshape(3 * Cout, 1)

    # ---- Pass 2: conv recompute + BN affine + maxpool + ELU, tiled & parallel ---------
    vec_spec = pl.BlockSpec((3 * Cout, 1), lambda b, l: (0, 0))
    out = pl.pallas_call(
        functools.partial(_norm_kernel, Cout=Cout),
        out_shape=jax.ShapeDtypeStruct((B, Cout, Lp), jnp.float32),
        grid_spec=pltpu.PrefetchScalarGridSpec(
            num_scalar_prefetch=0,
            grid=grid,
            in_specs=[x5_spec, w_spec, vec_spec, vec_spec],
            out_specs=pl.BlockSpec((1, Cout, TL), lambda b, l: (b, 0, l)),
        ),
        compiler_params=cparams,
    )(X5, Wbig, scale3, shift3)

    return out[:, :, :Lout] if Lp != Lout else out


def ref_forward(x_ncl, w_oik, b_o, gamma_o, beta_o, eps=1e-5):
    """Pure-JAX reference of the PyTorch module (training-mode BatchNorm)."""
    B, Cin, L = x_ncl.shape
    Cout = w_oik.shape[0]
    y = lax.conv_general_dilated(
        x_ncl.astype(jnp.float32),
        w_oik.astype(jnp.float32),
        window_strides=(1,),
        padding=((1, 1),),
        dimension_numbers=("NCH", "OIH", "NCH"),
    ) + b_o.reshape(1, Cout, 1)
    mean = jnp.mean(y, axis=(0, 2), keepdims=True)
    var = jnp.mean((y - mean) ** 2, axis=(0, 2), keepdims=True)
    z = (y - mean) * lax.rsqrt(var + eps) * gamma_o.reshape(1, Cout, 1) + beta_o.reshape(
        1, Cout, 1
    )
    e = jnp.where(z > 0, z, jnp.exp(jnp.minimum(z, 0.0)) - 1.0)
    Lout = L // 3
    return e[:, :, : Lout * 3].reshape(B, Cout, Lout, 3).max(axis=-1)


if __name__ == "__main__":
    B, Cin, Cout, L = 2, 4, 8, 24  # small shapes consistent with Conv1d(ins=4, outs=8)

    key = jax.random.PRNGKey(0)
    k_x, k_w, k_b = jax.random.split(key, 3)
    x = jax.random.normal(k_x, (B, Cin, L), jnp.float32)

    # Deterministic parameter init (PyTorch shapes): Conv1d weight (Cout, Cin, 3), bias (Cout,)
    fan_in = Cin * 3
    bound = 1.0 / (fan_in ** 0.5)
    w = jax.random.uniform(k_w, (Cout, Cin, 3), jnp.float32, -bound, bound)
    b = jax.random.uniform(k_b, (Cout,), jnp.float32, -bound, bound)
    gamma = jnp.ones((Cout,), jnp.float32)   # BatchNorm1d default affine weight
    beta = jnp.zeros((Cout,), jnp.float32)   # BatchNorm1d default affine bias
    # TODO(synk): BatchNorm running_mean/running_var buffer updates (training-state side
    # effect) are not modeled; the forward output itself uses batch stats as PyTorch does.

    out = conv_block_forward(x, w, b, gamma, beta)
    out = jax.block_until_ready(out)

    ref = ref_forward(x, w, b, gamma, beta)
    assert out.shape == (B, Cout, L // 3)
    assert jnp.allclose(out, ref, atol=1e-4, rtol=1e-4)
    print("KERNEL_OK")
</pallas_src>

<mosaic_0001>
module attributes {stable_mosaic.version = 11 : i64} {
  func.func @_stats_kernel(%arg0: i32, %arg1: i32, %arg2: memref<1x20x8xf32, #tpu.memory_space<vmem>>, %arg3: memref<24x20xf32, #tpu.memory_space<vmem>>, %arg4: memref<1x1x24x1xf32, #tpu.memory_space<vmem>>, %arg5: memref<1x1x24x1xf32, #tpu.memory_space<vmem>>) attributes {dimension_semantics = [#tpu.dimension_semantics<parallel>, #tpu.dimension_semantics<parallel>], iteration_bounds = array<i64: 2, 1>, scalar_prefetch = 0 : i64, scratch_operands = 0 : i64, tpu.core_type = #tpu.core_type<tc>, window_params = [{transform_indices = @transform_0, window_bounds = array<i64: 1, 20, 8>}, {pipeline_mode = #tpu.pipeline_mode<synchronous>, transform_indices = @transform_1, window_bounds = array<i64: 24, 20>}, {transform_indices = @transform_2, window_bounds = array<i64: 1, 1, 24, 1>}, {transform_indices = @transform_3, window_bounds = array<i64: 1, 1, 24, 1>}]} {
    %c0 = arith.constant 0 : index
    %c0_0 = arith.constant 0 : index
    %0 = vector.load %arg3[%c0, %c0_0] : memref<24x20xf32, #tpu.memory_space<vmem>>, vector<24x20xf32>
    %c0_1 = arith.constant 0 : index
    %c0_2 = arith.constant 0 : index
    %c0_3 = arith.constant 0 : index
    %1 = vector.load %arg2[%c0_1, %c0_2, %c0_3] : memref<1x20x8xf32, #tpu.memory_space<vmem>>, vector<1x20x8xf32>
    %2 = vector.shape_cast %1 : vector<1x20x8xf32> to vector<20x8xf32>
    %cst = arith.constant dense<0.000000e+00> : vector<24x8xf32>
    %3 = tpu.matmul %0, %2, %cst {dimension_numbers = #tpu.dot_dimension_numbers<[1], [0], [0], [1], [0, 0, 1, 1], [], []>} : vector<24x20xf32>, vector<20x8xf32>, vector<24x8xf32> -> vector<24x8xf32>
    %cst_4 = arith.constant dense<0.000000e+00> : vector<24xf32>
    %4 = vector.multi_reduction <add>, %3, %cst_4 [1] : vector<24x8xf32> to vector<24xf32>
    %5 = vector.shape_cast %4 : vector<24xf32> to vector<24x1xf32>
    %c0_5 = arith.constant 0 : index
    %c0_6 = arith.constant 0 : index
    %c0_7 = arith.constant 0 : index
    %c0_8 = arith.constant 0 : index
    %6 = vector.load %arg4[%c0_5, %c0_6, %c0_7, %c0_8] : memref<1x1x24x1xf32, #tpu.memory_space<vmem>>, vector<1x1x24x1xf32>
    %7 = vector.shape_cast %6 : vector<1x1x24x1xf32> to vector<24x1xf32>
    %8 = vector.shape_cast %5 : vector<24x1xf32> to vector<1x1x24x1xf32>
    tpu.vector_store %arg4[%c0_5, %c0_6, %c0_7, %c0_8], %8 {strides = array<i32>} : memref<1x1x24x1xf32, #tpu.memory_space<vmem>>, vector<1x1x24x1xf32>,
    %9 = arith.mulf %3, %3 : vector<24x8xf32>
    %cst_9 = arith.constant dense<0.000000e+00> : vector<24xf32>
    %10 = vector.multi_reduction <add>, %9, %cst_9 [1] : vector<24x8xf32> to vector<24xf32>
    %11 = vector.shape_cast %10 : vector<24xf32> to vector<24x1xf32>
    %c0_10 = arith.constant 0 : index
    %c0_11 = arith.constant 0 : index
    %c0_12 = arith.constant 0 : index
    %c0_13 = arith.constant 0 : index
    %12 = vector.load %arg5[%c0_10, %c0_11, %c0_12, %c0_13] : memref<1x1x24x1xf32, #tpu.memory_space<vmem>>, vector<1x1x24x1xf32>
    %13 = vector.shape_cast %12 : vector<1x1x24x1xf32> to vector<24x1xf32>
    %14 = vector.shape_cast %11 : vector<24x1xf32> to vector<1x1x24x1xf32>
    tpu.vector_store %arg5[%c0_10, %c0_11, %c0_12, %c0_13], %14 {strides = array<i32>} : memref<1x1x24x1xf32, #tpu.memory_space<vmem>>, vector<1x1x24x1xf32>,
    return
  }
  func.func @transform_0(%arg0: i32, %arg1: i32) -> (i32, i32, i32) {
    %c0_i32 = arith.constant 0 : i32
    %c0_i32_0 = arith.constant 0 : i32
    return %arg0, %c0_i32, %arg1 : i32, i32, i32
  }
  func.func @transform_1(%arg0: i32, %arg1: i32) -> (i32, i32) {
    %c0_i32 = arith.constant 0 : i32
    %c0_i32_0 = arith.constant 0 : i32
    %c0_i32_1 = arith.constant 0 : i32
    return %c0_i32, %c0_i32_0 : i32, i32
  }
  func.func @transform_2(%arg0: i32, %arg1: i32) -> (i32, i32, i32, i32) {
    %c0_i32 = arith.constant 0 : i32
    %c0_i32_0 = arith.constant 0 : i32
    %c0_i32_1 = arith.constant 0 : i32
    return %arg0, %arg1, %c0_i32, %c0_i32_0 : i32, i32, i32, i32
  }
  func.func @transform_3(%arg0: i32, %arg1: i32) -> (i32, i32, i32, i32) {
    %c0_i32 = arith.constant 0 : i32
    %c0_i32_0 = arith.constant 0 : i32
    %c0_i32_1 = arith.constant 0 : i32
    return %arg0, %arg1, %c0_i32, %c0_i32_0 : i32, i32, i32, i32
  }
}

module attributes {stable_mosaic.version = 11 : i64} {
  func.func @_norm_kernel(%arg0: i32, %arg1: i32, %arg2: memref<1x20x8xf32, #tpu.memory_space<vmem>>, %arg3: memref<24x20xf32, #tpu.memory_space<vmem>>, %arg4: memref<24x1xf32, #tpu.memory_space<vmem>>, %arg5: memref<24x1xf32, #tpu.memory_space<vmem>>, %arg6: memref<1x8x8xf32, #tpu.memory_space<vmem>>) attributes {dimension_semantics = [#tpu.dimension_semantics<parallel>, #tpu.dimension_semantics<parallel>], iteration_bounds = array<i64: 2, 1>, scalar_prefetch = 0 : i64, scratch_operands = 0 : i64, tpu.core_type = #tpu.core_type<tc>, window_params = [{transform_indices = @transform_0, window_bounds = array<i64: 1, 20, 8>}, {pipeline_mode = #tpu.pipeline_mode<synchronous>, transform_indices = @transform_1, window_bounds = array<i64: 24, 20>}, {pipeline_mode = #tpu.pipeline_mode<synchronous>, transform_indices = @transform_2, window_bounds = array<i64: 24, 1>}, {pipeline_mode = #tpu.pipeline_mode<synchronous>, transform_indices = @transform_3, window_bounds = array<i64: 24, 1>}, {transform_indices = @transform_4, window_bounds = array<i64: 1, 8, 8>}]} {
    %c0 = arith.constant 0 : index
    %c0_0 = arith.constant 0 : index
    %0 = vector.load %arg3[%c0, %c0_0] : memref<24x20xf32, #tpu.memory_space<vmem>>, vector<24x20xf32>
    %c0_1 = arith.constant 0 : index
    %c0_2 = arith.constant 0 : index
    %c0_3 = arith.constant 0 : index
    %1 = vector.load %arg2[%c0_1, %c0_2, %c0_3] : memref<1x20x8xf32, #tpu.memory_space<vmem>>, vector<1x20x8xf32>
    %2 = vector.shape_cast %1 : vector<1x20x8xf32> to vector<20x8xf32>
    %cst = arith.constant dense<0.000000e+00> : vector<24x8xf32>
    %3 = tpu.matmul %0, %2, %cst {dimension_numbers = #tpu.dot_dimension_numbers<[1], [0], [0], [1], [0, 0, 1, 1], [], []>} : vector<24x20xf32>, vector<20x8xf32>, vector<24x8xf32> -> vector<24x8xf32>
    %c0_4 = arith.constant 0 : index
    %c0_5 = arith.constant 0 : index
    %4 = vector.load %arg4[%c0_4, %c0_5] : memref<24x1xf32, #tpu.memory_space<vmem>>, vector<24x1xf32>
    %5 = vector.broadcast %4 : vector<24x1xf32> to vector<24x8xf32>
    %6 = arith.mulf %3, %5 : vector<24x8xf32>
    %c0_6 = arith.constant 0 : index
    %c0_7 = arith.constant 0 : index
    %7 = vector.load %arg5[%c0_6, %c0_7] : memref<24x1xf32, #tpu.memory_space<vmem>>, vector<24x1xf32>
    %8 = vector.broadcast %7 : vector<24x1xf32> to vector<24x8xf32>
    %9 = arith.addf %6, %8 : vector<24x8xf32>
    %10 = vector.extract_strided_slice %9 {offsets = [0, 0], sizes = [8, 8], strides = [1, 1]} : vector<24x8xf32> to vector<8x8xf32>
    %11 = vector.extract_strided_slice %9 {offsets = [8, 0], sizes = [8, 8], strides = [1, 1]} : vector<24x8xf32> to vector<8x8xf32>
    %12 = arith.maximumf %10, %11 : vector<8x8xf32>
    %13 = vector.extract_strided_slice %9 {offsets = [16, 0], sizes = [8, 8], strides = [1, 1]} : vector<24x8xf32> to vector<8x8xf32>
    %14 = arith.maximumf %12, %13 : vector<8x8xf32>
    %cst_8 = arith.constant 0.000000e+00 : f32
    %15 = vector.broadcast %cst_8 : f32 to vector<8x8xf32>
    %16 = arith.cmpf ogt, %14, %15 : vector<8x8xf32>
    %cst_9 = arith.constant 0.000000e+00 : f32
    %17 = vector.broadcast %cst_9 : f32 to vector<8x8xf32>
    %18 = arith.minimumf %14, %17 : vector<8x8xf32>
    %19 = math.exp %18 : vector<8x8xf32>
    %cst_10 = arith.constant 1.000000e+00 : f32
    %20 = vector.broadcast %cst_10 : f32 to vector<8x8xf32>
    %21 = arith.subf %19, %20 : vector<8x8xf32>
    %22 = arith.select %16, %14, %21 : vector<8x8xi1>, vector<8x8xf32>
    %c0_11 = arith.constant 0 : index
    %c0_12 = arith.constant 0 : index
    %c0_13 = arith.constant 0 : index
    %23 = vector.load %arg6[%c0_11, %c0_12, %c0_13] : memref<1x8x8xf32, #tpu.memory_space<vmem>>, vector<1x8x8xf32>
    %24 = vector.shape_cast %23 : vector<1x8x8xf32> to vector<8x8xf32>
    %25 = vector.shape_cast %22 : vector<8x8xf32> to vector<1x8x8xf32>
    tpu.vector_store %arg6[%c0_11, %c0_12, %c0_13], %25 {strides = array<i32>} : memref<1x8x8xf32, #tpu.memory_space<vmem>>, vector<1x8x8xf32>,
    return
  }
  func.func @transform_0(%arg0: i32, %arg1: i32) -> (i32, i32, i32) {
    %c0_i32 = arith.constant 0 : i32
    %c0_i32_0 = arith.constant 0 : i32
    return %arg0, %c0_i32, %arg1 : i32, i32, i32
  }
  func.func @transform_1(%arg0: i32, %arg1: i32) -> (i32, i32) {
    %c0_i32 = arith.constant 0 : i32
    %c0_i32_0 = arith.constant 0 : i32
    %c0_i32_1 = arith.constant 0 : i32
    return %c0_i32, %c0_i32_0 : i32, i32
  }
  func.func @transform_2(%arg0: i32, %arg1: i32) -> (i32, i32) {
    %c0_i32 = arith.constant 0 : i32
    %c0_i32_0 = arith.constant 0 : i32
    %c0_i32_1 = arith.constant 0 : i32
    return %c0_i32, %c0_i32_0 : i32, i32
  }
  func.func @transform_3(%arg0: i32, %arg1: i32) -> (i32, i32) {
    %c0_i32 = arith.constant 0 : i32
    %c0_i32_0 = arith.constant 0 : i32
    %c0_i32_1 = arith.constant 0 : i32
    return %c0_i32, %c0_i32_0 : i32, i32
  }
  func.func @transform_4(%arg0: i32, %arg1: i32) -> (i32, i32, i32) {
    %c0_i32 = arith.constant 0 : i32
    %c0_i32_0 = arith.constant 0 : i32
    return %arg0, %c0_i32, %arg1 : i32, i32, i32
  }
}

</mosaic_0001>

<bundles_post_ra>
// kernel: squeeze.20
= control target key start
LH: loop header
LB: loop body
LE: loop exit
PB: predicated region body
PF: predicated region fallthrough
CT: control target
= control target key end

     0   :  { %s30_s8 = smov 112   ;;  %vm7_vm0 = vcmask 64512   ;;  %s47_s0 = inlined_call_operand.vmem [shape: f32[24], index: 0, kind: input, shape index: {}]   ;;  %s48_s1 = inlined_call_operand.vmem [shape: f32[3,8], index: 1, kind: output, shape index: {}]  }
   0x1   :  { %v4_v0 = vld [vmem:[%s47_s0] sm:$0x1]  ;;  %s29_s0 = smov 120  }
   0x2   :  { %5 = vst [vmem:[#allocation1] sm:$0x1] %v4_v0 }
   0x9   :  { %v9_v1 = vld [vmem:[#allocation1] sm:$0x1]  }
   0xa   :  { %10 = vrot.lane.b32.xlu0 %v9_v1, %s29_s0  ;;  %v15_v2 = vld [vmem:[#allocation1] sm:$0x1]  }
   0xb   :  { %v6_v3 = vld [vmem:[#allocation1] sm:$0x1]  }
   0xc   :  { %8 = vst.msk [vmem:[#allocation0] sm:$0x1] %vm7_vm0, %v6_v3  }
  0x12   :  { %16 = vrot.lane.b32.xlu0 %v15_v2, %s30_s8 }
  0x7c   :  { %v11_v4 = vpop.permute.xlu0 %10  }
  0x7d   :  { %14 = vst.msk [vmem:[#allocation0 + $0x1] sm:$0x1] %vm7_vm0, %v11_v4  }
  0x84   :  { %v17_v5 = vpop.permute.xlu0 %16  }
  0x85   :  { %20 = vst.msk [vmem:[#allocation0 + $0x2] sm:$0x1] %vm7_vm0, %v17_v5  }
  0x8c   :  { %v23_v6 = vld [vmem:[#allocation0] sm:$0xf] }
  0x8d   :  { %26 = vst [vmem:[%s48_s1] sm:$0xf] %v23_v6 }

// kernel: tile.18
= control target key start
LH: loop header
LB: loop body
LE: loop exit
PB: predicated region body
PF: predicated region fallthrough
CT: control target
= control target key end

     0   :  { %s22_s0 = inlined_call_operand.vmem [shape: f32[8], index: 0, kind: input, shape index: {}]   ;;  %s23_s1 = inlined_call_operand.vmem [shape: f32[3,8], index: 1, kind: output, shape index: {}]  }
   0x1   :  { %v4_v0 = vld [vmem:[%s22_s0] ss:$0 sm:$0xff] }
   0x2   :  { %5 = vst [vmem:[%s23_s1] sm:$0xf] %v4_v0 }

// kernel: tile.0
= control target key start
LH: loop header
LB: loop body
LE: loop exit
PB: predicated region body
PF: predicated region fallthrough
CT: control target
= control target key end

     0   :  { %s66_s8 = smov 125   ;;  %s67_s9 = smov 123   ;;  %vm7_vm0 = vcmask 7168   ;;  %s117_s0 = inlined_call_operand.vmem [shape: f32[3,8], index: 0, kind: input, shape index: {}]   ;;  %s118_s1 = inlined_call_operand.vmem [shape: f32[24,1], index: 1, kind: output, shape index: {}]  }
   0x1   :  { %v4_v0 = vld [vmem:[%s117_s0] sm:$0xf]  ;;  %s65_s0 = smov 127   ;;  %s68_s10 = smov 126  }
   0x2   :  { %5 = vst [vmem:[#allocation0] sm:$0xf] %v4_v0  ;;  %s69_s11 = smov 124   ;;  %s70_s12 = smov 122  }
   0x3   :  { %s71_s13 = smov 121  }
   0x9   :  { %v9_v1 = vld [vmem:[#allocation0] sm:$0x7]  }
   0xa   :  { %v21_v2 = vld [vmem:[#allocation0] sm:$0x7]   ;;  %10 = vrot.lane.b32.xlu0 %v9_v1, %s65_s0 }
   0xb   :  { %22 = vrot.lane.b32.xlu1 %v21_v2, %s66_s8  ;;  %v33_v3 = vld [vmem:[#allocation0] sm:$0x7]  }
   0xc   :  { %34 = vrot.lane.b32.xlu2 %v33_v3, %s67_s9  ;;  %v15_v4 = vld [vmem:[#allocation0] sm:$0x7]  }
   0xd   :  { %v27_v5 = vld [vmem:[#allocation0] sm:$0x7]  }
   0xe   :  { %v39_v6 = vld [vmem:[#allocation0] sm:$0x7]  }
   0xf   :  { %v45_v7 = vld [vmem:[#allocation0] sm:$0x7]  }
  0x10   :  { %v6_v8 = vld [vmem:[#allocation0] sm:$0x7]  }
  0x11   :  { %8 = vst.msk [vmem:[%s118_s1] ss:$8 sm:$0x7] %vm7_vm0, %v6_v8  }
  0x12   :  { %16 = vrot.lane.b32.xlu0 %v15_v4, %s68_s10 }
  0x13   :  { %28 = vrot.lane.b32.xlu1 %v27_v5, %s69_s11 }
  0x14   :  { %40 = vrot.lane.b32.xlu2 %v39_v6, %s70_s12 }
  0x1a   :  { %46 = vrot.lane.b32.xlu0 %v45_v7, %s71_s13 }
  0x66   :  { %v35_v9 = vpop.permute.xlu2 %34  }
  0x67   :  { %55 = vst.msk [vmem:[%s118_s1 + $0x5] ss:$8 sm:$0x7] %vm7_vm0, %v35_v9  }
  0x6e   :  { %v41_v10 = vpop.permute.xlu2 %40  }
  0x6f   :  { %56 = vst.msk [vmem:[%s118_s1 + $0x6] ss:$8 sm:$0x7] %vm7_vm0, %v41_v10  }
  0x7c   :  { %v11_v11 = vpop.permute.xlu0 %10  }
  0x7d   :  { %v23_v12 = vpop.permute.xlu1 %22   ;;  %51 = vst.msk [vmem:[%s118_s1 + $0x1] ss:$8 sm:$0x7] %vm7_vm0, %v11_v11  }
  0x7e   :  { %53 = vst.msk [vmem:[%s118_s1 + $0x3] ss:$8 sm:$0x7] %vm7_vm0, %v23_v12  }
  0x84   :  { %v17_v13 = vpop.permute.xlu0 %16  }
  0x85   :  { %v29_v14 = vpop.permute.xlu1 %28   ;;  %52 = vst.msk [vmem:[%s118_s1 + $0x2] ss:$8 sm:$0x7] %vm7_vm0, %v17_v13  }
  0x86   :  { %54 = vst.msk [vmem:[%s118_s1 + $0x4] ss:$8 sm:$0x7] %vm7_vm0, %v29_v14  }
  0x8c   :  { %v47_v15 = vpop.permute.xlu0 %46  }
  0x8d   :  { %57 = vst.msk [vmem:[%s118_s1 + $0x7] ss:$8 sm:$0x7] %vm7_vm0, %v47_v15  }

// kernel: conv_block_forward.3
= control target key start
LH: loop header
LB: loop body
LE: loop exit
PB: predicated region body
PF: predicated region fallthrough
CT: control target
= control target key end

     0   :  { %9 = vsyncpa [#allocation3], 0  ;;  %s724_s0 = inlined_call_operand.vmem [shape: f32[2,20,8], index: 0, kind: input, shape index: {}]   ;;  %s725_s1 = inlined_call_operand.vmem [shape: f32[24,20], index: 1, kind: input, shape index: {}]   ;;  %s726_s2 = inlined_call_operand.vmem [shape: f32[24,1], index: 2, kind: input, shape index: {}]   ;;  %s727_s3 = inlined_call_operand.vmem [shape: f32[24,1], index: 3, kind: input, shape index: {}]   ;;  %s728_s4 = inlined_call_operand.hbm [shape: f32[2,8,8], index: 4, kind: output, shape index: {}]  }
   0x1   :  { %11 = vsyncpa [#allocation3 + $0x1], 0  ;;  %s600_s15 = smov 0   ;;  %s602_s16 = smov 0  }
   0x2   :  { %s604_s17 = smov 0   ;;  %s606_s18 = smov 0  }
   0x3   :  { %s608_s19 = smov 0   ;;  %s610_s20 = smov 0  }
   0x4 LB: > { %s410_s21 = sadd.s32 4294967295, %s572_s20   ;;  %s411_s22 = sadd.s32 4294967294, %s572_s20   ;;  %s572_s20 = sphi %s610_s20, %s17_s20   ;;  %s568_s19 = sphi %s608_s19, %s735_s19   ;;  %s564_s18 = sphi %s606_s18, %s734_s18   ;;  %s560_s17 = sphi %s604_s17, %s733_s17   ;;  %s556_s16 = sphi %s602_s16, %s732_s16   ;;  %s552_s15 = sphi %s600_s15, %s731_s15  }
   0x5   : > { %s29_s23 = sadd.s32 1, %s568_s19  ;;  %s129_s24 = sadd.s32 1, %s560_s17 }
   0x6   : > { %p31_p0 = scmp.ge.s32.totalorder %s29_s23, 2  ;;  %p139_p1 = scmp.ne.s32.totalorder %s560_s17, %s556_s16 }
   0x7   : > { %p140_p2 = scmp.eq.s32.totalorder %s410_s21, 1  ;;  %p145_p3 = scmp.ne.s32.totalorder %s556_s16, %s552_s15 }
   0x8   : > { %s737_s23 = smov (%p31_p0, %s29_s23), 0  ;;  %p146_p5 = scmp.eq.s32.totalorder %s411_s22, 1 }
   0x9   : > { %p640_p4 = por %p140_p2, %p139_p1  ;;  %s124_s26 = ssub.s32 %s568_s19, %s737_s23 }
   0xa   : > { %p414_p6 = scmp.ge.s32.totalorder %s572_s20, 1  ;;  %p127_p7 = scmp.eq.s32.totalorder %s124_s26, 0 }
   0xb   : > { %p647_p8 = por %p146_p5, %p145_p3  ;;  %p184_p9 = scmp.lt.s32.totalorder %s572_s20, 3 }
   0xc   : > { %s653_s28 = scalar_select %p127_p7, %s560_s17, %s129_s24  }
   0xd   : > { %p185_p10 = pnand %p414_p6, %p184_p9 }
   0xe   : > { %p213_p11 = scmp.lt.s32.totalorder (!%p185_p10), %s564_s18, 1  ;;  %s423_s12 = sshll.u32 (!%p185_p10), %s564_s18, 3 }
   0xf   : > { %188 = sbr.rel (%p185_p10) target bundleno = 188 (0xbc), region = 36  ;;  %s331_s21 = scalar_lea.hbm (!%p185_p10), %s728_s4, %s423_s12 }
  0x10   : > { %s335_s26 = sshll.u32 (!%p185_p10), %s331_s21, 4  ;;  %s336_s26 = int_to_ptr.hbm [resolvable:$true] %s335_s26 }
  0x11   : > { %s508_s30 = sshra.s32 (!%p185_p10), %s336_s26, 4  ;;  %s509_s30 = int_to_ptr.hbm [resolvable:$true] %s508_s30 }
  0x12   : > { %p515_p1 = scmp.lt.s32.totalorder (!%p185_p10), %s509_s30, %s728_s4 }
  0x14   : > { %v267_v0 = vld [vmem:[%s726_s2] sm:$0xff]  ;;  %v574_v1 = vmov 0   ;;  %v269_v2 = vld [vmem:[%s726_s2 + $0x10] sm:$0xff]  ;;  %s214_s7 = scalar_select %p213_p11, %s564_s18, 1  ;;  %v289_v3 = vld [vmem:[%s727_s3 + $0x8] sm:$0xff]  ;;  %vm237_vm0 = vcmask 1043456  }
  0x15   : > { %489 = vset.pattern.permute.xlu0 %v574_v1  ;;  %490 = vset.pattern.permute.xlu1 %v574_v1  ;;  %v268_v6 = vld [vmem:[%s726_s2 + $0x8] sm:$0xff]  ;;  %v221_v8 = vld [vmem:[%s725_s1] sm:$0xff]  ;;  %vm227_vm1 = vcmask 162816   ;;  %v223_v10 = vld [vmem:[%s725_s1 + $0x10] sm:$0xff]  ;;  %vm317_vm2 = vcmask 64512   ;;  %s510_s18 = scalar_lea.hbm %s509_s30, 8 }
  0x16   : > { %272 = vperm.xlu0 %489, %v267_v0   ;;  %282 = vperm.xlu1 %490, %v269_v2   ;;  %s432_s10 = smul.u32 24, %s214_s7  ;;  %v222_v9 = vld [vmem:[%s725_s1 + $0x8] sm:$0xff]  ;;  %v288_v11 = vld [vmem:[%s727_s3] sm:$0xff]  ;;  %v290_v12 = vld [vmem:[%s727_s3 + $0x10] sm:$0xff]  ;;  %p511_p12 = scmp.ne.s32.totalorder %s509_s30, %s510_s18 }
  0x17   : > { %491 = vset.pattern.permute.xlu2 %v574_v1  ;;  %s514_s7 = scalar_lea.hbm %s728_s4, 16 }
  0x18   : > { %298 = vperm.xlu2 %491, %v289_v3   ;;  %s220_s13 = scalar_lea.vmem %s724_s0, %s432_s10  ;;  %s210_s10 = sand.u32 1, %s556_s16  }
  0x19   : > { %v226_v4 = vld [vmem:[%s220_s13 + $0x10] sm:$0xf]  ;;  %v225_v5 = vld [vmem:[%s220_s13 + $0x8] sm:$0xff]  ;;  %v224_v7 = vld [vmem:[%s220_s13] sm:$0xff]  ;;  %s415_s11 = sshll.u32 %s210_s10, 3  ;;  %s320_s29 = scalar_lea.sflag [#allocation3], %s210_s10 }
  0x1a   : > { %417 = vmatpush.msk.msra.mxu0 %vm237_vm0, %v226_v4  ;;  %426 = vmatpush.msk.msra.mxu1 %vm237_vm0, %v226_v4  ;;  %s212_s22 = scalar_lea.vmem [#allocation2], %s415_s11  ;;  %p512_p13 = pnand %p511_p12, %p640_p4 }
  0x1b   : > { %427 = vmatpush.msk.msra.mxu2 %vm237_vm0, %v226_v4  ;;  %s333_s24 = sshll.u32 %s212_s22, 4  ;;  %p516_p2 = scmp.lt.s32.totalorder %s514_s7, %s510_s18  ;;  %s334_s24 = int_to_ptr.vmem [resolvable:$true] %s333_s24 }
  0x1c   : > { %255 = vmatpush.msra.mxu0 %v225_v5  ;;  %428 = vmatpush.msra.mxu1 %v225_v5  ;;  %p513_p0 = pneg %p512_p13 }
  0x1d   : > { %429 = vmatpush.msra.mxu2 %v225_v5  ;;  %p517_p3 = por %p516_p2, %p515_p1 }
  0x1e   : > { %277 = vperm.xlu0 %489, %v268_v6   ;;  %256 = vmatpush.msra.mxu0 %v224_v7 }
  0x1f   : > { %430 = vmatpush.msra.mxu1 %v224_v7  ;;  %431 = vmatpush.msra.mxu2 %v224_v7  ;;  %p518_p5 = pnand %p517_p3, %p513_p0 }
  0x20   : > { %418 = vmatmul.msk.f32.vlgmr.msra.gmra.mxu0 %vm227_vm1, %v221_v8  ;;  %419 = vmatmul.msk.f32.vlgmr.msra.gmra.mxu1 %vm227_vm1, %v222_v9 }
  0x21   : > { %420 = vmatmul.msk.f32.vlgmr.msra.gmra.mxu2 %vm227_vm1, %v223_v10  ;;  %293 = vperm.xlu1 %490, %v288_v11  }
  0x22   : > { %303 = vperm.xlu2 %491, %v290_v12  }
  0x72   : > { %v299_v15 = vpop.permute.xlu2 %298 }
  0x7c   : > { %v304_v26 = vpop.permute.xlu2 %303 }
  0x88   : > { %v273_v13 = vpop.permute.xlu0 %272  ;;  %v283_v14 = vpop.permute.xlu1 %282 }
  0x90   : > { %v278_v17 = vpop.permute.xlu0 %277 }
  0x93   : > { %v294_v21 = vpop.permute.xlu1 %293 }
  0x9d   : > { %v258_v16 = vpop.f32.mrf.mxu0  ;;  %v261_v18 = vpop.f32.mrf.mxu1 }
  0x9e   : > { %v285_v19 = vmul.f32 %v273_v13, %v258_v16  ;;  %v286_v20 = vmul.f32 %v278_v17, %v261_v18 }
  0xa0   : > { %v306_v22 = vadd.f32 %v294_v21, %v285_v19  ;;  %v307_v23 = vadd.f32 %v299_v15, %v286_v20 }
  0xa2   : > { %v309_v27 = vmax.f32 %v306_v22, %v307_v23 }
  0xa4   : > { %v264_v24 = vpop.f32.mrf.mxu2 }
  0xa5   : > { %v287_v25 = vmul.f32 %v283_v14, %v264_v24 }
  0xa7   : > { %v308_v28 = vadd.f32 %v304_v26, %v287_v25 }
  0xa9   : > { %v310_v29 = vmax.f32 %v309_v27, %v308_v28 }
  0xab   : > { %v312_v30 = vmin.f32 %v310_v29, 0.0  ;;  %vm311_vm3 = vcmp.gt.f32.partialorder %v310_v29, 0.0 }
  0xad   : > { %v313_v31 = vmul.f32 1.442695, %v312_v30 }
  0xaf   : > { %492 = vpow2.f32 %v313_v31 }
  0xb5   : > { %v493_v32 = vpop.eup %492 }
  0xb6   : > { %v421_v33 = vadd.f32 -1.0, %v493_v32 }
  0xb8   : > { %v316_v34 = vsel %vm311_vm3, %v310_v29, %v421_v33 }
  0xb9   : > { %318 = vst.msk [vmem:[%s212_s22] sm:$0xff] %vm317_vm2, %v316_v34 }
  0xba   : > { %521 = shalt.err (!%p518_p5)
}
  0xbb   : > { %433 = dma.vmem_to_hbm [thread:$0]  (%p640_p4), %s334_s24, 128, %s336_s26, %s320_s29  }
  0xbc PF: > { %p439_p6 = scmp.ge.s32.totalorder %s572_s20, 2  ;;  %s347_s10 = sand.u32 1, %s552_s15  }
  0xbd   : > { %s348_s11 = scalar_lea.sflag [#allocation3], %s347_s10 }
  0xbe   : > { %p436_p7 = pnand %p439_p6, %p647_p8 }
  0xc0   : > { %p437_p9 = pneg %p436_p7 }
  0xc2   : > { %547 = dma.done.wait (%p437_p9), %s348_s11, 128  }
  0xc3   : > { %549 = vsyncadd (%p437_p9), %s348_s11, 4294967168  ;;  %s17_s20 = sadd.s32 1, %s572_s20   ;;  %s731_s15 = smov %s556_s16 }
  0xc4   : > { %p14_p10 = scmp.ge.s32.totalorder %s17_s20, 4   ;;  %s732_s16 = smov %s560_s17 }
  0xc5   : > { %s733_s17 = smov %s653_s28  ;;  %s734_s18 = smov %s568_s19 }
  0xc6   : > { %s735_s19 = smov %s737_s23  ;;  %16 = sbr.rel (!%p14_p10) target bundleno = 4 (0x4), region = 71 }
  0xcb   :  { %354 = vsyncpa [#allocation3], 1 }
  0xcc   :  { %356 = vsyncpa [#allocation3 + $0x1], 1 }

// kernel: conv_block_forward.2
= control target key start
LH: loop header
LB: loop body
LE: loop exit
PB: predicated region body
PF: predicated region fallthrough
CT: control target
= control target key end

     0   :  { %s533_s12 = smov 0   ;;  %s535_s13 = smov 0   ;;  %s589_s0 = inlined_call_operand.vmem [shape: f32[2,20,8], index: 0, kind: input, shape index: {}]   ;;  %s590_s1 = inlined_call_operand.vmem [shape: f32[24,20], index: 1, kind: input, shape index: {}]   ;;  %s591_s2 = inlined_call_operand.vmem [shape: f32[2,1,24,1], index: 2, kind: output, shape index: {0}]   ;;  %s592_s3 = inlined_call_operand.vmem [shape: f32[2,1,24,1], index: 3, kind: output, shape index: {1}]  }
   0x1   :  { %s537_s14 = smov 0  }
   0x2 LB: > { %s26_s15 = sadd.s32 1, %s507_s13  ;;  %p448_p0 = scmp.ge.s32.totalorder %s511_s14, 1  ;;  %s511_s14 = sphi %s537_s14, %s14_s14   ;;  %s507_s13 = sphi %s535_s13, %s594_s13   ;;  %s503_s12 = sphi %s533_s12, %s593_s12  }
   0x3   : > { %p28_p1 = scmp.ge.s32.totalorder %s26_s15, 2  ;;  %p161_p2 = scmp.lt.s32.totalorder %s511_s14, 3 }
   0x5   : > { %s596_s15 = smov (%p28_p1, %s26_s15), 0  ;;  %p162_p3 = pnand %p448_p0, %p161_p2 }
   0x6   : > { %p201_p4 = scmp.lt.s32.totalorder (!%p162_p3), %s503_s12, 1 }
   0x7   : > { %165 = sbr.rel (%p162_p3) target bundleno = 281 (0x119), region = 28 }
   0xc   : > { %s598_s12 = smov (!%p201_p4, %s503_s12), 1  ;;  %vm243_vm0 = vcmask 1043456   ;;  %v227_v3 = vld [vmem:[%s590_s1] sm:$0xff]  ;;  %vm233_vm1 = vcmask 162816   ;;  %v228_v4 = vld [vmem:[%s590_s1 + $0x8] sm:$0xff]  ;;  %v229_v5 = vld [vmem:[%s590_s1 + $0x10] sm:$0xff] }
   0xd   : > { %s551_s16 = smul.u32 24, %s598_s12  ;;  %vm273_vm2 = vcmask 64512   ;;  %vm283_vm3 = vcmask 7168  }
   0xf   : > { %s208_s19 = scalar_lea.vmem %s589_s0, %s551_s16  ;;  %s217_s28 = scalar_lea.vmem %s591_s2, %s551_s16 }
  0x10   : > { %v232_v0 = vld [vmem:[%s208_s19 + $0x10] sm:$0xf]  ;;  %v231_v1 = vld [vmem:[%s208_s19 + $0x8] sm:$0xff]  ;;  %v230_v2 = vld [vmem:[%s208_s19] sm:$0xff]  ;;  %s226_s4 = scalar_lea.vmem %s592_s3, %s551_s16 }
  0x11   : > { %452 = vmatpush.msk.msra.mxu0 %vm243_vm0, %v232_v0  ;;  %458 = vmatpush.msk.msra.mxu1 %vm243_vm0, %v232_v0 }
  0x12   : > { %459 = vmatpush.msk.msra.mxu2 %vm243_vm0, %v232_v0 }
  0x13   : > { %261 = vmatpush.msra.mxu0 %v231_v1  ;;  %460 = vmatpush.msra.mxu1 %v231_v1 }
  0x14   : > { %461 = vmatpush.msra.mxu2 %v231_v1 }
  0x15   : > { %262 = vmatpush.msra.mxu0 %v230_v2  ;;  %462 = vmatpush.msra.mxu1 %v230_v2 }
  0x16   : > { %463 = vmatpush.msra.mxu2 %v230_v2  ;;  %453 = vmatmul.msk.f32.vlgmr.msra.gmra.mxu0 %vm233_vm1, %v227_v3 }
  0x17   : > { %454 = vmatmul.msk.f32.vlgmr.msra.gmra.mxu1 %vm233_vm1, %v228_v4  ;;  %455 = vmatmul.msk.f32.vlgmr.msra.gmra.mxu2 %vm233_vm1, %v229_v5 }
  0x93   : > { %v264_v6 = vpop.f32.mrf.mxu0 }
  0x94   : > { %v267_v7 = vpop.f32.mrf.mxu1  ;;  %v274_v8 = vsel %vm273_vm2, %v264_v6, 0.0  ;;  %v287_v15 = vmul.f32 %v264_v6, %v264_v6 }
  0x95   : > { %v288_v9 = vmul.f32 %v267_v7, %v267_v7  ;;  %275 = vadd.xlane.f32.xlu0 %v274_v8  ;;  %v277_v14 = vsel %vm273_vm2, %v267_v7, 0.0 }
  0x96   : > { %v290_v17 = vsel %vm273_vm2, %v287_v15, 0.0 }
  0x97   : > { %v293_v10 = vsel %vm273_vm2, %v288_v9, 0.0 }
  0x98   : > { %294 = vadd.xlane.f32.xlu2 %v293_v10 }
  0x9a   : > { %v270_v11 = vpop.f32.mrf.mxu2 }
  0x9b   : > { %v289_v12 = vmul.f32 %v270_v11, %v270_v11  ;;  %v280_v13 = vsel %vm273_vm2, %v270_v11, 0.0 }
  0x9c   : > { %281 = vadd.xlane.f32.xlu1 %v280_v13 }
  0x9d   : > { %278 = vadd.xlane.f32.xlu0 %v277_v14  ;;  %v296_v16 = vsel %vm273_vm2, %v289_v12, 0.0 }
  0xa0   : > { %297 = vadd.xlane.f32.xlu2 %v296_v16 }
  0xa4   : > { %291 = vadd.xlane.f32.xlu1 %v290_v17 }
 0x108   : > { %v276_v18 = vpop.xlane.xlu0 %275 }
 0x109   : > { %284 = vst.msk [vmem:[%s217_s28] sm:$0xff] %vm283_vm3, %v276_v18 }
 0x10b   : > { %v295_v19 = vpop.xlane.xlu2 %294 }
 0x10c   : > { %300 = vst.msk [vmem:[%s226_s4 + $0x8] sm:$0xff] %vm283_vm3, %v295_v19 }
 0x10f   : > { %v282_v20 = vpop.xlane.xlu1 %281 }
 0x110   : > { %286 = vst.msk [vmem:[%s217_s28 + $0x10] sm:$0xff] %vm283_vm3, %v282_v20  ;;  %v279_v21 = vpop.xlane.xlu0 %278 }
 0x111   : > { %285 = vst.msk [vmem:[%s217_s28 + $0x8] sm:$0xff] %vm283_vm3, %v279_v21 }
 0x113   : > { %v298_v22 = vpop.xlane.xlu2 %297 }
 0x114   : > { %301 = vst.msk [vmem:[%s226_s4 + $0x10] sm:$0xff] %vm283_vm3, %v298_v22 }
 0x117   : > { %v292_v23 = vpop.xlane.xlu1 %291 }
 0x118   : > { %299 = vst.msk [vmem:[%s226_s4] sm:$0xff] %vm283_vm3, %v292_v23 }
 0x119 PF: > { %s14_s14 = sadd.s32 1, %s511_s14   ;;  %s593_s12 = smov %s507_s13 }
 0x11a   : > { %p11_p5 = scmp.ge.s32.totalorder %s14_s14, 4   ;;  %s594_s13 = smov %s596_s15 }
 0x11c   :  { %13 = sbr.rel (!%p11_p5) target bundleno = 2 (0x2), region = 70 }

</bundles_post_ra>
